<compile_context>
chip_gen: v5e
topology: v5e:2x2
jax: 0.10.0
libtpu: 0.0.40
codegen_flags: <defaults>
</compile_context>

<pallas_src>
import functools

import jax
import jax.numpy as jnp
from jax.experimental import pallas as pl
from jax.experimental.pallas import tpu as pltpu


_VMEM_LIMIT_BYTES = 48 * 1024 * 1024   # < 64 MiB physical VMEM on v7x, plenty on v5e/v6e.
_TILE_BUDGET_BYTES = 20 * 1024 * 1024  # double-buffered tile footprint budget (all gens).


def _round_up(x, m):
    return ((x + m - 1) // m) * m


# --------------------------------------------------------------------------- #
# Path A: small channel counts -- fused per-(b, f) plane kernel (VPU + tiny MXU)
# --------------------------------------------------------------------------- #
def _fused_plane_kernel(x_ref, wl_ref, bl_ref, e_ref, er_ref, o_ref):
    # x_ref : (C, H, W)            input plane for this (b, f)
    # wl_ref: (dim_out*r*C, W*s)   lane-periodic weight vectors (f32)
    # bl_ref: (dim_out*r, W*s)     lane-periodic bias vectors (f32)
    # e_ref : (W, W*s)             0/1 lane-expansion matrix (col w -> lanes j with j//s == w)
    # er_ref: (r, H*r, H)          0/1 row-scatter matrices (row h -> output row h*r + ri)
    # o_ref : (dim_out, H*r, W*s)  final-layout output plane
    C, H, W = x_ref.shape
    dim_out, Hr, Ws = o_ref.shape
    r = er_ref.shape[0]

    e = e_ref[...]
    # Lane-expand every input channel once: xe[c][h, j] = x[c, h, j // s].
    xe = [
        jnp.dot(x_ref[c].astype(jnp.float32), e, preferred_element_type=jnp.float32)
        for c in range(C)
    ]

    for co in range(dim_out):
        out_plane = jnp.zeros((Hr, Ws), jnp.float32)
        for ri in range(r):
            row = co * r + ri
            acc = jnp.zeros((H, Ws), jnp.float32)
            for ci in range(C):
                wvec = wl_ref[pl.ds(row * C + ci, 1), :]      # (1, Ws) lane-periodic weight
                acc = acc + wvec * xe[ci]                     # VPU broadcast-MAC
            acc = acc + bl_ref[pl.ds(row, 1), :]              # bias
            # SiLU epilogue; the approximate reciprocal stays on the EUP slot.
            act = acc * pl.reciprocal(1.0 + jnp.exp(-acc), approx=True)
            # Scatter rows h -> output rows h*r + ri (0/1 matmul on the idle MXU).
            out_plane = out_plane + jnp.dot(
                er_ref[ri], act, preferred_element_type=jnp.float32)
        o_ref[co] = out_plane.astype(o_ref.dtype)


def _pixel_shuffle_small(x, weight, bias, dim_out, r, s, out_dtype):
    B, C, F, H, W = x.shape
    Ws, Hr = W * s, H * r

    wf = weight.astype(jnp.float32).reshape(dim_out, r, s, C)
    bf = bias.astype(jnp.float32).reshape(dim_out, r, s)
    lane_si = jnp.arange(Ws) % s
    # wl[(c*r + ri)*C + cin, j] = weight[c*r*s + ri*s + (j % s), cin]
    wl = jnp.transpose(wf[:, :, lane_si, :], (0, 1, 3, 2)).reshape(dim_out * r * C, Ws)
    bl = bf[:, :, lane_si].reshape(dim_out * r, Ws)

    # 0/1 helper matrices: lane expansion (W -> W*s) and row scatter (H -> H*r).
    e = (jnp.arange(W)[:, None] == (jnp.arange(Ws)[None, :] // s)).astype(jnp.float32)
    rows = jnp.arange(Hr)
    er = ((rows[None, :, None] % r == jnp.arange(r)[:, None, None])
          & (rows[None, :, None] // r == jnp.arange(H)[None, None, :])).astype(jnp.float32)

    out_elems = B * dim_out * F * Hr * Ws
    flops = 2 * B * F * (C * H * W * Ws + dim_out * r * C * H * Ws
                         + dim_out * r * Hr * H * Ws)
    bytes_accessed = (x.size * x.dtype.itemsize + wl.size * 4 + bl.size * 4
                      + out_elems * jnp.dtype(out_dtype).itemsize)

    return pl.pallas_call(
        _fused_plane_kernel,
        out_shape=jax.ShapeDtypeStruct((B, dim_out, F, Hr, Ws), out_dtype),
        grid=(B, F),
        in_specs=[
            pl.BlockSpec((None, C, None, H, W), lambda b, f: (b, 0, f, 0, 0)),
            pl.BlockSpec((dim_out * r * C, Ws), lambda b, f: (0, 0)),
            pl.BlockSpec((dim_out * r, Ws), lambda b, f: (0, 0)),
            pl.BlockSpec((W, Ws), lambda b, f: (0, 0)),
            pl.BlockSpec((r, Hr, H), lambda b, f: (0, 0, 0)),
        ],
        out_specs=pl.BlockSpec((None, dim_out, None, Hr, Ws),
                               lambda b, f: (b, 0, f, 0, 0)),
        compiler_params=pltpu.CompilerParams(
            dimension_semantics=("parallel", "parallel"),
            vmem_limit_bytes=_VMEM_LIMIT_BYTES,
        ),
        cost_estimate=pl.CostEstimate(
            flops=int(flops),
            transcendentals=int(out_elems),
            bytes_accessed=int(bytes_accessed)),
    )(x, wl, bl, e, er)


# --------------------------------------------------------------------------- #
# Path B: large channel counts -- channels-last MXU matmul + SiLU epilogue
# --------------------------------------------------------------------------- #
def _matmul_silu_kernel(x_ref, w_ref, b_ref, o_ref):
    # x_ref: (TM, C), w_ref: (C, O), b_ref: (1, O), o_ref: (TM, O)
    y = jnp.dot(x_ref[...], w_ref[...], preferred_element_type=jnp.float32)
    y = y + b_ref[...]
    o_ref[...] = (y * pl.reciprocal(1.0 + jnp.exp(-y), approx=True)).astype(o_ref.dtype)


def _pick_tile_m(n_rows, c, o, in_bytes, out_bytes, requested=1024):
    tile = max(8, _round_up(min(requested, _round_up(n_rows, 8)), 8))

    def footprint(t):  # double-buffered in/out tiles + resident weights
        return 2 * t * (c * in_bytes + o * out_bytes) + c * o * in_bytes

    while tile > 8 and footprint(tile) > _TILE_BUDGET_BYTES:
        tile = max(8, _round_up(tile // 2, 8))
    # Keep >= 2 grid steps when the problem allows it (lets megacore split the grid).
    while tile >= 512 and pl.cdiv(n_rows, tile) < 2:
        tile //= 2
    return tile


def _conv1x1_silu(x_flat, w_co, bias, out_dtype, tile_m=1024):
    """x_flat: (N, C), w_co: (C, O), bias: (O,) -> SiLU(x_flat @ w_co + bias): (N, O)."""
    N, C = x_flat.shape
    O = w_co.shape[1]
    in_bytes = x_flat.dtype.itemsize
    out_bytes = jnp.dtype(out_dtype).itemsize

    tm = _pick_tile_m(N, C, O, in_bytes, out_bytes, requested=tile_m)
    n_pad = _round_up(N, tm)
    if n_pad != N:
        x_flat = jnp.pad(x_flat, ((0, n_pad - N), (0, 0)))

    b2 = bias.astype(jnp.float32).reshape(1, O)

    out = pl.pallas_call(
        _matmul_silu_kernel,
        out_shape=jax.ShapeDtypeStruct((n_pad, O), out_dtype),
        grid=(n_pad // tm,),
        in_specs=[
            pl.BlockSpec((tm, C), lambda i: (i, 0)),
            pl.BlockSpec((C, O), lambda i: (0, 0)),
            pl.BlockSpec((1, O), lambda i: (0, 0)),
        ],
        out_specs=pl.BlockSpec((tm, O), lambda i: (i, 0)),
        compiler_params=pltpu.CompilerParams(
            dimension_semantics=("parallel",),
            vmem_limit_bytes=_VMEM_LIMIT_BYTES,
        ),
        cost_estimate=pl.CostEstimate(
            flops=int(2 * N * C * O),
            transcendentals=int(N * O),
            bytes_accessed=int(N * C * in_bytes + C * O * in_bytes + N * O * out_bytes)),
    )(x_flat, w_co, b2)
    return out[:N] if n_pad != N else out


# --------------------------------------------------------------------------- #
# Public wrapper (forward pass of the PyTorch module)
# --------------------------------------------------------------------------- #
@functools.partial(jax.jit, static_argnames=("scale_factor", "compute_dtype"))
def pixel_shuffle_upsample(x, weight, bias, *, scale_factor=2, compute_dtype=None):
    """x: (B, C, F, H, W); weight: (O, C) with O = dim_out*scale^2; bias: (O,).

    Returns SiLU(conv1x1(x)) pixel-shuffled to (B, dim_out, F, H*scale, W*scale).
    `compute_dtype=jnp.bfloat16` casts x/weight at the kernel boundary (f32 accum).
    """
    B, C, F, H, W = x.shape
    O = weight.shape[0]
    r = s = scale_factor
    dim_out = O // (r * s)
    out_dtype = x.dtype

    if compute_dtype is not None:
        x = x.astype(compute_dtype)
        weight = weight.astype(compute_dtype)

    small = (
        C <= 32 and dim_out <= 32
        and (dim_out * r * C * W * s + C * H * W + dim_out * H * r * W * s) * 4 <= (8 << 20)
    )
    if small:
        # Fully fused path: no channels-last transpose, no pad, no post rearrange.
        return _pixel_shuffle_small(x, weight, bias, dim_out, r, s, out_dtype)

    # Large-channel path: MXU matmul over channels with lane-dense (tile_m, O) tiles.
    # TODO(synk): fuse the pixel-shuffle rearrange into this path's out_spec as well;
    # for now the final rearrange below is left to XLA.
    x_flat = jnp.transpose(x, (0, 2, 3, 4, 1)).reshape(-1, C)            # (N, C)
    y = _conv1x1_silu(x_flat, jnp.transpose(weight), bias, out_dtype)    # (N, O)
    y = y.reshape(B, F, H, W, dim_out, r, s)
    y = jnp.transpose(y, (0, 4, 1, 2, 5, 3, 6))                          # (B, c, F, H, r, W, s)
    return y.reshape(B, dim_out, F, H * r, W * s)


def _reference(x, weight, bias, *, scale_factor=2):
    """Plain-JAX reference mirroring the PyTorch forward (exact SiLU)."""
    B, C, F, H, W = x.shape
    O = weight.shape[0]
    r = s = scale_factor
    dim_out = O // (r * s)
    y = jnp.einsum('bcfhw,oc->bofhw', x.astype(jnp.float32), weight.astype(jnp.float32))
    y = y + bias.astype(jnp.float32)[None, :, None, None, None]
    y = y * jax.nn.sigmoid(y)
    y = y.reshape(B, dim_out, r, s, F, H, W)
    y = jnp.transpose(y, (0, 1, 4, 5, 2, 6, 3))
    return y.reshape(B, dim_out, F, H * r, W * s)


if __name__ == "__main__":
    key = jax.random.PRNGKey(0)
    scale = 2

    # ---- Test 1: demo shapes (tiny channels) -> fused small-channel kernel ----
    B, dim, Fr, H, W = 2, 4, 3, 8, 8
    dim_out = dim                        # default(dim_out, dim)
    O = dim_out * scale * scale
    k1, k2, k3, k4 = jax.random.split(key, 4)
    x = jax.random.normal(k1, (B, dim, Fr, H, W), dtype=jnp.float32)
    # Fully independent random weight + nonzero bias so a wrong (c, r, s)
    # factorization in the shuffle cannot silently pass the check.
    w = 0.5 * jax.random.normal(k2, (O, dim), dtype=jnp.float32)
    b = 0.1 * jax.random.normal(k3, (O,), dtype=jnp.float32)

    out = jax.block_until_ready(pixel_shuffle_upsample(x, w, b, scale_factor=scale))
    ref = _reference(x, w, b, scale_factor=scale)
    assert out.shape == (B, dim_out, Fr, H * scale, W * scale), out.shape
    # Tolerance covers the approximate EUP reciprocal in the SiLU epilogue.
    assert jnp.allclose(out, ref, atol=2e-2, rtol=2e-2), "small-channel path mismatch"

    # ---- Test 2: larger channels -> MXU matmul path (f32) ----
    B2, C2, F2, H2, W2 = 1, 64, 2, 8, 8
    dim_out2 = 64
    O2 = dim_out2 * scale * scale
    k5, k6, k7 = jax.random.split(k4, 3)
    x2 = jax.random.normal(k5, (B2, C2, F2, H2, W2), dtype=jnp.float32)
    w2 = jax.random.normal(k6, (O2, C2), dtype=jnp.float32) / jnp.sqrt(float(C2))
    b2 = 0.1 * jax.random.normal(k7, (O2,), dtype=jnp.float32)

    out2 = jax.block_until_ready(pixel_shuffle_upsample(x2, w2, b2, scale_factor=scale))
    ref2 = _reference(x2, w2, b2, scale_factor=scale)
    assert out2.shape == (B2, dim_out2, F2, H2 * scale, W2 * scale), out2.shape
    assert jnp.allclose(out2, ref2, atol=2e-2, rtol=2e-2), "MXU path mismatch"

    # ---- Test 3: bf16 inputs on the MXU path (f32 accumulation in-kernel) ----
    out3 = jax.block_until_ready(
        pixel_shuffle_upsample(x2, w2, b2, scale_factor=scale,
                               compute_dtype=jnp.bfloat16))
    ref3 = _reference(x2.astype(jnp.bfloat16).astype(jnp.float32),
                      w2.astype(jnp.bfloat16).astype(jnp.float32),
                      b2, scale_factor=scale)
    assert jnp.allclose(out3, ref3, atol=3e-2, rtol=3e-2), "bf16 path mismatch"

    print("KERNEL_OK")
</pallas_src>

<mosaic_0001>
module attributes {stable_mosaic.version = 11 : i64} {
  func.func @_fused_plane_kernel(%arg0: i32, %arg1: i32, %arg2: memref<1x4x1x8x8xf32, #tpu.memory_space<vmem>>, %arg3: memref<32x16xf32, #tpu.memory_space<vmem>>, %arg4: memref<8x16xf32, #tpu.memory_space<vmem>>, %arg5: memref<8x16xf32, #tpu.memory_space<vmem>>, %arg6: memref<2x16x8xf32, #tpu.memory_space<vmem>>, %arg7: memref<1x4x1x16x16xf32, #tpu.memory_space<vmem>>) attributes {dimension_semantics = [#tpu.dimension_semantics<parallel>, #tpu.dimension_semantics<parallel>], iteration_bounds = array<i64: 2, 3>, scalar_prefetch = 0 : i64, scratch_operands = 0 : i64, tpu.core_type = #tpu.core_type<tc>, window_params = [{transform_indices = @transform_0, window_bounds = array<i64: 1, 4, 1, 8, 8>}, {pipeline_mode = #tpu.pipeline_mode<synchronous>, transform_indices = @transform_1, window_bounds = array<i64: 32, 16>}, {pipeline_mode = #tpu.pipeline_mode<synchronous>, transform_indices = @transform_2, window_bounds = array<i64: 8, 16>}, {pipeline_mode = #tpu.pipeline_mode<synchronous>, transform_indices = @transform_3, window_bounds = array<i64: 8, 16>}, {pipeline_mode = #tpu.pipeline_mode<synchronous>, transform_indices = @transform_4, window_bounds = array<i64: 2, 16, 8>}, {transform_indices = @transform_5, window_bounds = array<i64: 1, 4, 1, 16, 16>}]} {
    %c0 = arith.constant 0 : index
    %c0_0 = arith.constant 0 : index
    %0 = vector.load %arg5[%c0, %c0_0] : memref<8x16xf32, #tpu.memory_space<vmem>>, vector<8x16xf32>
    %c0_1 = arith.constant 0 : index
    %c0_2 = arith.constant 0 : index
    %c0_3 = arith.constant 0 : index
    %c0_4 = arith.constant 0 : index
    %c0_5 = arith.constant 0 : index
    %1 = vector.load %arg2[%c0_1, %c0_2, %c0_3, %c0_4, %c0_5] : memref<1x4x1x8x8xf32, #tpu.memory_space<vmem>>, vector<1x1x1x8x8xf32>
    %2 = vector.shape_cast %1 : vector<1x1x1x8x8xf32> to vector<8x8xf32>
    %cst = arith.constant dense<0.000000e+00> : vector<8x16xf32>
    %3 = tpu.matmul %2, %0, %cst {dimension_numbers = #tpu.dot_dimension_numbers<[1], [0], [0], [1], [0, 0, 1, 1], [], []>} : vector<8x8xf32>, vector<8x16xf32>, vector<8x16xf32> -> vector<8x16xf32>
    %c0_6 = arith.constant 0 : index
    %c1 = arith.constant 1 : index
    %c0_7 = arith.constant 0 : index
    %c0_8 = arith.constant 0 : index
    %c0_9 = arith.constant 0 : index
    %4 = vector.load %arg2[%c0_6, %c1, %c0_7, %c0_8, %c0_9] : memref<1x4x1x8x8xf32, #tpu.memory_space<vmem>>, vector<1x1x1x8x8xf32>
    %5 = vector.shape_cast %4 : vector<1x1x1x8x8xf32> to vector<8x8xf32>
    %cst_10 = arith.constant dense<0.000000e+00> : vector<8x16xf32>
    %6 = tpu.matmul %5, %0, %cst_10 {dimension_numbers = #tpu.dot_dimension_numbers<[1], [0], [0], [1], [0, 0, 1, 1], [], []>} : vector<8x8xf32>, vector<8x16xf32>, vector<8x16xf32> -> vector<8x16xf32>
    %c0_11 = arith.constant 0 : index
    %c2 = arith.constant 2 : index
    %c0_12 = arith.constant 0 : index
    %c0_13 = arith.constant 0 : index
    %c0_14 = arith.constant 0 : index
    %7 = vector.load %arg2[%c0_11, %c2, %c0_12, %c0_13, %c0_14] : memref<1x4x1x8x8xf32, #tpu.memory_space<vmem>>, vector<1x1x1x8x8xf32>
    %8 = vector.shape_cast %7 : vector<1x1x1x8x8xf32> to vector<8x8xf32>
    %cst_15 = arith.constant dense<0.000000e+00> : vector<8x16xf32>
    %9 = tpu.matmul %8, %0, %cst_15 {dimension_numbers = #tpu.dot_dimension_numbers<[1], [0], [0], [1], [0, 0, 1, 1], [], []>} : vector<8x8xf32>, vector<8x16xf32>, vector<8x16xf32> -> vector<8x16xf32>
    %c0_16 = arith.constant 0 : index
    %c3 = arith.constant 3 : index
    %c0_17 = arith.constant 0 : index
    %c0_18 = arith.constant 0 : index
    %c0_19 = arith.constant 0 : index
    %10 = vector.load %arg2[%c0_16, %c3, %c0_17, %c0_18, %c0_19] : memref<1x4x1x8x8xf32, #tpu.memory_space<vmem>>, vector<1x1x1x8x8xf32>
    %11 = vector.shape_cast %10 : vector<1x1x1x8x8xf32> to vector<8x8xf32>
    %cst_20 = arith.constant dense<0.000000e+00> : vector<8x16xf32>
    %12 = tpu.matmul %11, %0, %cst_20 {dimension_numbers = #tpu.dot_dimension_numbers<[1], [0], [0], [1], [0, 0, 1, 1], [], []>} : vector<8x8xf32>, vector<8x16xf32>, vector<8x16xf32> -> vector<8x16xf32>
    %cst_21 = arith.constant 0.000000e+00 : f32
    %13 = vector.broadcast %cst_21 : f32 to vector<16x16xf32>
    %cst_22 = arith.constant 0.000000e+00 : f32
    %14 = vector.broadcast %cst_22 : f32 to vector<8x16xf32>
    %c0_23 = arith.constant 0 : index
    %c0_24 = arith.constant 0 : index
    %15 = vector.load %arg3[%c0_23, %c0_24] : memref<32x16xf32, #tpu.memory_space<vmem>>, vector<1x16xf32>
    %16 = vector.broadcast %15 : vector<1x16xf32> to vector<8x16xf32>
    %17 = arith.mulf %16, %3 : vector<8x16xf32>
    %18 = arith.addf %14, %17 : vector<8x16xf32>
    %c1_25 = arith.constant 1 : index
    %c0_26 = arith.constant 0 : index
    %19 = vector.load %arg3[%c1_25, %c0_26] : memref<32x16xf32, #tpu.memory_space<vmem>>, vector<1x16xf32>
    %20 = vector.broadcast %19 : vector<1x16xf32> to vector<8x16xf32>
    %21 = arith.mulf %20, %6 : vector<8x16xf32>
    %22 = arith.addf %18, %21 : vector<8x16xf32>
    %c2_27 = arith.constant 2 : index
    %c0_28 = arith.constant 0 : index
    %23 = vector.load %arg3[%c2_27, %c0_28] : memref<32x16xf32, #tpu.memory_space<vmem>>, vector<1x16xf32>
    %24 = vector.broadcast %23 : vector<1x16xf32> to vector<8x16xf32>
    %25 = arith.mulf %24, %9 : vector<8x16xf32>
    %26 = arith.addf %22, %25 : vector<8x16xf32>
    %c3_29 = arith.constant 3 : index
    %c0_30 = arith.constant 0 : index
    %27 = vector.load %arg3[%c3_29, %c0_30] : memref<32x16xf32, #tpu.memory_space<vmem>>, vector<1x16xf32>
    %28 = vector.broadcast %27 : vector<1x16xf32> to vector<8x16xf32>
    %29 = arith.mulf %28, %12 : vector<8x16xf32>
    %30 = arith.addf %26, %29 : vector<8x16xf32>
    %c0_31 = arith.constant 0 : index
    %c0_32 = arith.constant 0 : index
    %31 = vector.load %arg4[%c0_31, %c0_32] : memref<8x16xf32, #tpu.memory_space<vmem>>, vector<1x16xf32>
    %32 = vector.broadcast %31 : vector<1x16xf32> to vector<8x16xf32>
    %33 = arith.addf %30, %32 : vector<8x16xf32>
    %cst_33 = arith.constant 0.000000e+00 : f32
    %34 = vector.broadcast %cst_33 : f32 to vector<8x16xf32>
    %35 = arith.subf %34, %33 : vector<8x16xf32>
    %36 = math.exp %35 : vector<8x16xf32>
    %cst_34 = arith.constant 1.000000e+00 : f32
    %37 = vector.broadcast %cst_34 : f32 to vector<8x16xf32>
    %38 = arith.addf %37, %36 : vector<8x16xf32>
    %39 = tpu.reciprocal %38 {approx = true} : vector<8x16xf32> -> vector<8x16xf32>
    %40 = arith.mulf %33, %39 : vector<8x16xf32>
    %c0_35 = arith.constant 0 : index
    %c0_36 = arith.constant 0 : index
    %c0_37 = arith.constant 0 : index
    %41 = vector.load %arg6[%c0_35, %c0_36, %c0_37] : memref<2x16x8xf32, #tpu.memory_space<vmem>>, vector<1x16x8xf32>
    %42 = vector.shape_cast %41 : vector<1x16x8xf32> to vector<16x8xf32>
    %cst_38 = arith.constant dense<0.000000e+00> : vector<16x16xf32>
    %43 = tpu.matmul %42, %40, %cst_38 {dimension_numbers = #tpu.dot_dimension_numbers<[1], [0], [0], [1], [0, 0, 1, 1], [], []>} : vector<16x8xf32>, vector<8x16xf32>, vector<16x16xf32> -> vector<16x16xf32>
    %44 = arith.addf %13, %43 : vector<16x16xf32>
    %cst_39 = arith.constant 0.000000e+00 : f32
    %45 = vector.broadcast %cst_39 : f32 to vector<8x16xf32>
    %c4 = arith.constant 4 : index
    %c0_40 = arith.constant 0 : index
    %46 = vector.load %arg3[%c4, %c0_40] : memref<32x16xf32, #tpu.memory_space<vmem>>, vector<1x16xf32>
    %47 = vector.broadcast %46 : vector<1x16xf32> to vector<8x16xf32>
    %48 = arith.mulf %47, %3 : vector<8x16xf32>
    %49 = arith.addf %45, %48 : vector<8x16xf32>
    %c5 = arith.constant 5 : index
    %c0_41 = arith.constant 0 : index
    %50 = vector.load %arg3[%c5, %c0_41] : memref<32x16xf32, #tpu.memory_space<vmem>>, vector<1x16xf32>
    %51 = vector.broadcast %50 : vector<1x16xf32> to vector<8x16xf32>
    %52 = arith.mulf %51, %6 : vector<8x16xf32>
    %53 = arith.addf %49, %52 : vector<8x16xf32>
    %c6 = arith.constant 6 : index
    %c0_42 = arith.constant 0 : index
    %54 = vector.load %arg3[%c6, %c0_42] : memref<32x16xf32, #tpu.memory_space<vmem>>, vector<1x16xf32>
    %55 = vector.broadcast %54 : vector<1x16xf32> to vector<8x16xf32>
    %56 = arith.mulf %55, %9 : vector<8x16xf32>
    %57 = arith.addf %53, %56 : vector<8x16xf32>
    %c7 = arith.constant 7 : index
    %c0_43 = arith.constant 0 : index
    %58 = vector.load %arg3[%c7, %c0_43] : memref<32x16xf32, #tpu.memory_space<vmem>>, vector<1x16xf32>
    %59 = vector.broadcast %58 : vector<1x16xf32> to vector<8x16xf32>
    %60 = arith.mulf %59, %12 : vector<8x16xf32>
    %61 = arith.addf %57, %60 : vector<8x16xf32>
    %c1_44 = arith.constant 1 : index
    %c0_45 = arith.constant 0 : index
    %62 = vector.load %arg4[%c1_44, %c0_45] : memref<8x16xf32, #tpu.memory_space<vmem>>, vector<1x16xf32>
    %63 = vector.broadcast %62 : vector<1x16xf32> to vector<8x16xf32>
    %64 = arith.addf %61, %63 : vector<8x16xf32>
    %cst_46 = arith.constant 0.000000e+00 : f32
    %65 = vector.broadcast %cst_46 : f32 to vector<8x16xf32>
    %66 = arith.subf %65, %64 : vector<8x16xf32>
    %67 = math.exp %66 : vector<8x16xf32>
    %cst_47 = arith.constant 1.000000e+00 : f32
    %68 = vector.broadcast %cst_47 : f32 to vector<8x16xf32>
    %69 = arith.addf %68, %67 : vector<8x16xf32>
    %70 = tpu.reciprocal %69 {approx = true} : vector<8x16xf32> -> vector<8x16xf32>
    %71 = arith.mulf %64, %70 : vector<8x16xf32>
    %c1_48 = arith.constant 1 : index
    %c0_49 = arith.constant 0 : index
    %c0_50 = arith.constant 0 : index
    %72 = vector.load %arg6[%c1_48, %c0_49, %c0_50] : memref<2x16x8xf32, #tpu.memory_space<vmem>>, vector<1x16x8xf32>
    %73 = vector.shape_cast %72 : vector<1x16x8xf32> to vector<16x8xf32>
    %cst_51 = arith.constant dense<0.000000e+00> : vector<16x16xf32>
    %74 = tpu.matmul %73, %71, %cst_51 {dimension_numbers = #tpu.dot_dimension_numbers<[1], [0], [0], [1], [0, 0, 1, 1], [], []>} : vector<16x8xf32>, vector<8x16xf32>, vector<16x16xf32> -> vector<16x16xf32>
    %75 = arith.addf %44, %74 : vector<16x16xf32>
    %c0_52 = arith.constant 0 : index
    %c0_53 = arith.constant 0 : index
    %c0_54 = arith.constant 0 : index
    %c0_55 = arith.constant 0 : index
    %c0_56 = arith.constant 0 : index
    %76 = vector.load %arg7[%c0_52, %c0_53, %c0_54, %c0_55, %c0_56] : memref<1x4x1x16x16xf32, #tpu.memory_space<vmem>>, vector<1x1x1x16x16xf32>
    %77 = vector.shape_cast %76 : vector<1x1x1x16x16xf32> to vector<16x16xf32>
    %78 = vector.shape_cast %75 : vector<16x16xf32> to vector<1x1x1x16x16xf32>
    tpu.vector_store %arg7[%c0_52, %c0_53, %c0_54, %c0_55, %c0_56], %78 {strides = array<i32>} : memref<1x4x1x16x16xf32, #tpu.memory_space<vmem>>, vector<1x1x1x16x16xf32>,
    %cst_57 = arith.constant 0.000000e+00 : f32
    %79 = vector.broadcast %cst_57 : f32 to vector<16x16xf32>
    %cst_58 = arith.constant 0.000000e+00 : f32
    %80 = vector.broadcast %cst_58 : f32 to vector<8x16xf32>
    %c8 = arith.constant 8 : index
    %c0_59 = arith.constant 0 : index
    %81 = vector.load %arg3[%c8, %c0_59] : memref<32x16xf32, #tpu.memory_space<vmem>>, vector<1x16xf32>
    %82 = vector.broadcast %81 : vector<1x16xf32> to vector<8x16xf32>
    %83 = arith.mulf %82, %3 : vector<8x16xf32>
    %84 = arith.addf %80, %83 : vector<8x16xf32>
    %c9 = arith.constant 9 : index
    %c0_60 = arith.constant 0 : index
    %85 = vector.load %arg3[%c9, %c0_60] : memref<32x16xf32, #tpu.memory_space<vmem>>, vector<1x16xf32>
    %86 = vector.broadcast %85 : vector<1x16xf32> to vector<8x16xf32>
    %87 = arith.mulf %86, %6 : vector<8x16xf32>
    %88 = arith.addf %84, %87 : vector<8x16xf32>
    %c10 = arith.constant 10 : index
    %c0_61 = arith.constant 0 : index
    %89 = vector.load %arg3[%c10, %c0_61] : memref<32x16xf32, #tpu.memory_space<vmem>>, vector<1x16xf32>
    %90 = vector.broadcast %89 : vector<1x16xf32> to vector<8x16xf32>
    %91 = arith.mulf %90, %9 : vector<8x16xf32>
    %92 = arith.addf %88, %91 : vector<8x16xf32>
    %c11 = arith.constant 11 : index
    %c0_62 = arith.constant 0 : index
    %93 = vector.load %arg3[%c11, %c0_62] : memref<32x16xf32, #tpu.memory_space<vmem>>, vector<1x16xf32>
    %94 = vector.broadcast %93 : vector<1x16xf32> to vector<8x16xf32>
    %95 = arith.mulf %94, %12 : vector<8x16xf32>
    %96 = arith.addf %92, %95 : vector<8x16xf32>
    %c2_63 = arith.constant 2 : index
    %c0_64 = arith.constant 0 : index
    %97 = vector.load %arg4[%c2_63, %c0_64] : memref<8x16xf32, #tpu.memory_space<vmem>>, vector<1x16xf32>
    %98 = vector.broadcast %97 : vector<1x16xf32> to vector<8x16xf32>
    %99 = arith.addf %96, %98 : vector<8x16xf32>
    %cst_65 = arith.constant 0.000000e+00 : f32
    %100 = vector.broadcast %cst_65 : f32 to vector<8x16xf32>
    %101 = arith.subf %100, %99 : vector<8x16xf32>
    %102 = math.exp %101 : vector<8x16xf32>
    %cst_66 = arith.constant 1.000000e+00 : f32
    %103 = vector.broadcast %cst_66 : f32 to vector<8x16xf32>
    %104 = arith.addf %103, %102 : vector<8x16xf32>
    %105 = tpu.reciprocal %104 {approx = true} : vector<8x16xf32> -> vector<8x16xf32>
    %106 = arith.mulf %99, %105 : vector<8x16xf32>
    %c0_67 = arith.constant 0 : index
    %c0_68 = arith.constant 0 : index
    %c0_69 = arith.constant 0 : index
    %107 = vector.load %arg6[%c0_67, %c0_68, %c0_69] : memref<2x16x8xf32, #tpu.memory_space<vmem>>, vector<1x16x8xf32>
    %108 = vector.shape_cast %107 : vector<1x16x8xf32> to vector<16x8xf32>
    %cst_70 = arith.constant dense<0.000000e+00> : vector<16x16xf32>
    %109 = tpu.matmul %108, %106, %cst_70 {dimension_numbers = #tpu.dot_dimension_numbers<[1], [0], [0], [1], [0, 0, 1, 1], [], []>} : vector<16x8xf32>, vector<8x16xf32>, vector<16x16xf32> -> vector<16x16xf32>
    %110 = arith.addf %79, %109 : vector<16x16xf32>
    %cst_71 = arith.constant 0.000000e+00 : f32
    %111 = vector.broadcast %cst_71 : f32 to vector<8x16xf32>
    %c12 = arith.constant 12 : index
    %c0_72 = arith.constant 0 : index
    %112 = vector.load %arg3[%c12, %c0_72] : memref<32x16xf32, #tpu.memory_space<vmem>>, vector<1x16xf32>
    %113 = vector.broadcast %112 : vector<1x16xf32> to vector<8x16xf32>
    %114 = arith.mulf %113, %3 : vector<8x16xf32>
    %115 = arith.addf %111, %114 : vector<8x16xf32>
    %c13 = arith.constant 13 : index
    %c0_73 = arith.constant 0 : index
    %116 = vector.load %arg3[%c13, %c0_73] : memref<32x16xf32, #tpu.memory_space<vmem>>, vector<1x16xf32>
    %117 = vector.broadcast %116 : vector<1x16xf32> to vector<8x16xf32>
    %118 = arith.mulf %117, %6 : vector<8x16xf32>
    %119 = arith.addf %115, %118 : vector<8x16xf32>
    %c14 = arith.constant 14 : index
    %c0_74 = arith.constant 0 : index
    %120 = vector.load %arg3[%c14, %c0_74] : memref<32x16xf32, #tpu.memory_space<vmem>>, vector<1x16xf32>
    %121 = vector.broadcast %120 : vector<1x16xf32> to vector<8x16xf32>
    %122 = arith.mulf %121, %9 : vector<8x16xf32>
    %123 = arith.addf %119, %122 : vector<8x16xf32>
    %c15 = arith.constant 15 : index
    %c0_75 = arith.constant 0 : index
    %124 = vector.load %arg3[%c15, %c0_75] : memref<32x16xf32, #tpu.memory_space<vmem>>, vector<1x16xf32>
    %125 = vector.broadcast %124 : vector<1x16xf32> to vector<8x16xf32>
    %126 = arith.mulf %125, %12 : vector<8x16xf32>
    %127 = arith.addf %123, %126 : vector<8x16xf32>
    %c3_76 = arith.constant 3 : index
    %c0_77 = arith.constant 0 : index
    %128 = vector.load %arg4[%c3_76, %c0_77] : memref<8x16xf32, #tpu.memory_space<vmem>>, vector<1x16xf32>
    %129 = vector.broadcast %128 : vector<1x16xf32> to vector<8x16xf32>
    %130 = arith.addf %127, %129 : vector<8x16xf32>
    %cst_78 = arith.constant 0.000000e+00 : f32
    %131 = vector.broadcast %cst_78 : f32 to vector<8x16xf32>
    %132 = arith.subf %131, %130 : vector<8x16xf32>
    %133 = math.exp %132 : vector<8x16xf32>
    %cst_79 = arith.constant 1.000000e+00 : f32
    %134 = vector.broadcast %cst_79 : f32 to vector<8x16xf32>
    %135 = arith.addf %134, %133 : vector<8x16xf32>
    %136 = tpu.reciprocal %135 {approx = true} : vector<8x16xf32> -> vector<8x16xf32>
    %137 = arith.mulf %130, %136 : vector<8x16xf32>
    %c1_80 = arith.constant 1 : index
    %c0_81 = arith.constant 0 : index
    %c0_82 = arith.constant 0 : index
    %138 = vector.load %arg6[%c1_80, %c0_81, %c0_82] : memref<2x16x8xf32, #tpu.memory_space<vmem>>, vector<1x16x8xf32>
    %139 = vector.shape_cast %138 : vector<1x16x8xf32> to vector<16x8xf32>
    %cst_83 = arith.constant dense<0.000000e+00> : vector<16x16xf32>
    %140 = tpu.matmul %139, %137, %cst_83 {dimension_numbers = #tpu.dot_dimension_numbers<[1], [0], [0], [1], [0, 0, 1, 1], [], []>} : vector<16x8xf32>, vector<8x16xf32>, vector<16x16xf32> -> vector<16x16xf32>
    %141 = arith.addf %110, %140 : vector<16x16xf32>
    %c0_84 = arith.constant 0 : index
    %c1_85 = arith.constant 1 : index
    %c0_86 = arith.constant 0 : index
    %c0_87 = arith.constant 0 : index
    %c0_88 = arith.constant 0 : index
    %142 = vector.load %arg7[%c0_84, %c1_85, %c0_86, %c0_87, %c0_88] : memref<1x4x1x16x16xf32, #tpu.memory_space<vmem>>, vector<1x1x1x16x16xf32>
    %143 = vector.shape_cast %142 : vector<1x1x1x16x16xf32> to vector<16x16xf32>
    %144 = vector.shape_cast %141 : vector<16x16xf32> to vector<1x1x1x16x16xf32>
    tpu.vector_store %arg7[%c0_84, %c1_85, %c0_86, %c0_87, %c0_88], %144 {strides = array<i32>} : memref<1x4x1x16x16xf32, #tpu.memory_space<vmem>>, vector<1x1x1x16x16xf32>,
    %cst_89 = arith.constant 0.000000e+00 : f32
    %145 = vector.broadcast %cst_89 : f32 to vector<16x16xf32>
    %cst_90 = arith.constant 0.000000e+00 : f32
    %146 = vector.broadcast %cst_90 : f32 to vector<8x16xf32>
    %c16 = arith.constant 16 : index
    %c0_91 = arith.constant 0 : index
    %147 = vector.load %arg3[%c16, %c0_91] : memref<32x16xf32, #tpu.memory_space<vmem>>, vector<1x16xf32>
    %148 = vector.broadcast %147 : vector<1x16xf32> to vector<8x16xf32>
    %149 = arith.mulf %148, %3 : vector<8x16xf32>
    %150 = arith.addf %146, %149 : vector<8x16xf32>
    %c17 = arith.constant 17 : index
    %c0_92 = arith.constant 0 : index
    %151 = vector.load %arg3[%c17, %c0_92] : memref<32x16xf32, #tpu.memory_space<vmem>>, vector<1x16xf32>
    %152 = vector.broadcast %151 : vector<1x16xf32> to vector<8x16xf32>
    %153 = arith.mulf %152, %6 : vector<8x16xf32>
    %154 = arith.addf %150, %153 : vector<8x16xf32>
    %c18 = arith.constant 18 : index
    %c0_93 = arith.constant 0 : index
    %155 = vector.load %arg3[%c18, %c0_93] : memref<32x16xf32, #tpu.memory_space<vmem>>, vector<1x16xf32>
    %156 = vector.broadcast %155 : vector<1x16xf32> to vector<8x16xf32>
    %157 = arith.mulf %156, %9 : vector<8x16xf32>
    %158 = arith.addf %154, %157 : vector<8x16xf32>
    %c19 = arith.constant 19 : index
    %c0_94 = arith.constant 0 : index
    %159 = vector.load %arg3[%c19, %c0_94] : memref<32x16xf32, #tpu.memory_space<vmem>>, vector<1x16xf32>
    %160 = vector.broadcast %159 : vector<1x16xf32> to vector<8x16xf32>
    %161 = arith.mulf %160, %12 : vector<8x16xf32>
    %162 = arith.addf %158, %161 : vector<8x16xf32>
    %c4_95 = arith.constant 4 : index
    %c0_96 = arith.constant 0 : index
    %163 = vector.load %arg4[%c4_95, %c0_96] : memref<8x16xf32, #tpu.memory_space<vmem>>, vector<1x16xf32>
    %164 = vector.broadcast %163 : vector<1x16xf32> to vector<8x16xf32>
    %165 = arith.addf %162, %164 : vector<8x16xf32>
    %cst_97 = arith.constant 0.000000e+00 : f32
    %166 = vector.broadcast %cst_97 : f32 to vector<8x16xf32>
    %167 = arith.subf %166, %165 : vector<8x16xf32>
    %168 = math.exp %167 : vector<8x16xf32>
    %cst_98 = arith.constant 1.000000e+00 : f32
    %169 = vector.broadcast %cst_98 : f32 to vector<8x16xf32>
    %170 = arith.addf %169, %168 : vector<8x16xf32>
    %171 = tpu.reciprocal %170 {approx = true} : vector<8x16xf32> -> vector<8x16xf32>
    %172 = arith.mulf %165, %171 : vector<8x16xf32>
    %c0_99 = arith.constant 0 : index
    %c0_100 = arith.constant 0 : index
    %c0_101 = arith.constant 0 : index
    %173 = vector.load %arg6[%c0_99, %c0_100, %c0_101] : memref<2x16x8xf32, #tpu.memory_space<vmem>>, vector<1x16x8xf32>
    %174 = vector.shape_cast %173 : vector<1x16x8xf32> to vector<16x8xf32>
    %cst_102 = arith.constant dense<0.000000e+00> : vector<16x16xf32>
    %175 = tpu.matmul %174, %172, %cst_102 {dimension_numbers = #tpu.dot_dimension_numbers<[1], [0], [0], [1], [0, 0, 1, 1], [], []>} : vector<16x8xf32>, vector<8x16xf32>, vector<16x16xf32> -> vector<16x16xf32>
    %176 = arith.addf %145, %175 : vector<16x16xf32>
    %cst_103 = arith.constant 0.000000e+00 : f32
    %177 = vector.broadcast %cst_103 : f32 to vector<8x16xf32>
    %c20 = arith.constant 20 : index
    %c0_104 = arith.constant 0 : index
    %178 = vector.load %arg3[%c20, %c0_104] : memref<32x16xf32, #tpu.memory_space<vmem>>, vector<1x16xf32>
    %179 = vector.broadcast %178 : vector<1x16xf32> to vector<8x16xf32>
    %180 = arith.mulf %179, %3 : vector<8x16xf32>
    %181 = arith.addf %177, %180 : vector<8x16xf32>
    %c21 = arith.constant 21 : index
    %c0_105 = arith.constant 0 : index
    %182 = vector.load %arg3[%c21, %c0_105] : memref<32x16xf32, #tpu.memory_space<vmem>>, vector<1x16xf32>
    %183 = vector.broadcast %182 : vector<1x16xf32> to vector<8x16xf32>
    %184 = arith.mulf %183, %6 : vector<8x16xf32>
    %185 = arith.addf %181, %184 : vector<8x16xf32>
    %c22 = arith.constant 22 : index
    %c0_106 = arith.constant 0 : index
    %186 = vector.load %arg3[%c22, %c0_106] : memref<32x16xf32, #tpu.memory_space<vmem>>, vector<1x16xf32>
    %187 = vector.broadcast %186 : vector<1x16xf32> to vector<8x16xf32>
    %188 = arith.mulf %187, %9 : vector<8x16xf32>
    %189 = arith.addf %185, %188 : vector<8x16xf32>
    %c23 = arith.constant 23 : index
    %c0_107 = arith.constant 0 : index
    %190 = vector.load %arg3[%c23, %c0_107] : memref<32x16xf32, #tpu.memory_space<vmem>>, vector<1x16xf32>
    %191 = vector.broadcast %190 : vector<1x16xf32> to vector<8x16xf32>
    %192 = arith.mulf %191, %12 : vector<8x16xf32>
    %193 = arith.addf %189, %192 : vector<8x16xf32>
    %c5_108 = arith.constant 5 : index
    %c0_109 = arith.constant 0 : index
    %194 = vector.load %arg4[%c5_108, %c0_109] : memref<8x16xf32, #tpu.memory_space<vmem>>, vector<1x16xf32>
    %195 = vector.broadcast %194 : vector<1x16xf32> to vector<8x16xf32>
    %196 = arith.addf %193, %195 : vector<8x16xf32>
    %cst_110 = arith.constant 0.000000e+00 : f32
    %197 = vector.broadcast %cst_110 : f32 to vector<8x16xf32>
    %198 = arith.subf %197, %196 : vector<8x16xf32>
    %199 = math.exp %198 : vector<8x16xf32>
    %cst_111 = arith.constant 1.000000e+00 : f32
    %200 = vector.broadcast %cst_111 : f32 to vector<8x16xf32>
    %201 = arith.addf %200, %199 : vector<8x16xf32>
    %202 = tpu.reciprocal %201 {approx = true} : vector<8x16xf32> -> vector<8x16xf32>
    %203 = arith.mulf %196, %202 : vector<8x16xf32>
    %c1_112 = arith.constant 1 : index
    %c0_113 = arith.constant 0 : index
    %c0_114 = arith.constant 0 : index
    %204 = vector.load %arg6[%c1_112, %c0_113, %c0_114] : memref<2x16x8xf32, #tpu.memory_space<vmem>>, vector<1x16x8xf32>
    %205 = vector.shape_cast %204 : vector<1x16x8xf32> to vector<16x8xf32>
    %cst_115 = arith.constant dense<0.000000e+00> : vector<16x16xf32>
    %206 = tpu.matmul %205, %203, %cst_115 {dimension_numbers = #tpu.dot_dimension_numbers<[1], [0], [0], [1], [0, 0, 1, 1], [], []>} : vector<16x8xf32>, vector<8x16xf32>, vector<16x16xf32> -> vector<16x16xf32>
    %207 = arith.addf %176, %206 : vector<16x16xf32>
    %c0_116 = arith.constant 0 : index
    %c2_117 = arith.constant 2 : index
    %c0_118 = arith.constant 0 : index
    %c0_119 = arith.constant 0 : index
    %c0_120 = arith.constant 0 : index
    %208 = vector.load %arg7[%c0_116, %c2_117, %c0_118, %c0_119, %c0_120] : memref<1x4x1x16x16xf32, #tpu.memory_space<vmem>>, vector<1x1x1x16x16xf32>
    %209 = vector.shape_cast %208 : vector<1x1x1x16x16xf32> to vector<16x16xf32>
    %210 = vector.shape_cast %207 : vector<16x16xf32> to vector<1x1x1x16x16xf32>
    tpu.vector_store %arg7[%c0_116, %c2_117, %c0_118, %c0_119, %c0_120], %210 {strides = array<i32>} : memref<1x4x1x16x16xf32, #tpu.memory_space<vmem>>, vector<1x1x1x16x16xf32>,
    %cst_121 = arith.constant 0.000000e+00 : f32
    %211 = vector.broadcast %cst_121 : f32 to vector<16x16xf32>
    %cst_122 = arith.constant 0.000000e+00 : f32
    %212 = vector.broadcast %cst_122 : f32 to vector<8x16xf32>
    %c24 = arith.constant 24 : index
    %c0_123 = arith.constant 0 : index
    %213 = vector.load %arg3[%c24, %c0_123] : memref<32x16xf32, #tpu.memory_space<vmem>>, vector<1x16xf32>
    %214 = vector.broadcast %213 : vector<1x16xf32> to vector<8x16xf32>
    %215 = arith.mulf %214, %3 : vector<8x16xf32>
    %216 = arith.addf %212, %215 : vector<8x16xf32>
    %c25 = arith.constant 25 : index
    %c0_124 = arith.constant 0 : index
    %217 = vector.load %arg3[%c25, %c0_124] : memref<32x16xf32, #tpu.memory_space<vmem>>, vector<1x16xf32>
    %218 = vector.broadcast %217 : vector<1x16xf32> to vector<8x16xf32>
    %219 = arith.mulf %218, %6 : vector<8x16xf32>
    %220 = arith.addf %216, %219 : vector<8x16xf32>
    %c26 = arith.constant 26 : index
    %c0_125 = arith.constant 0 : index
    %221 = vector.load %arg3[%c26, %c0_125] : memref<32x16xf32, #tpu.memory_space<vmem>>, vector<1x16xf32>
    %222 = vector.broadcast %221 : vector<1x16xf32> to vector<8x16xf32>
    %223 = arith.mulf %222, %9 : vector<8x16xf32>
    %224 = arith.addf %220, %223 : vector<8x16xf32>
    %c27 = arith.constant 27 : index
    %c0_126 = arith.constant 0 : index
    %225 = vector.load %arg3[%c27, %c0_126] : memref<32x16xf32, #tpu.memory_space<vmem>>, vector<1x16xf32>
    %226 = vector.broadcast %225 : vector<1x16xf32> to vector<8x16xf32>
    %227 = arith.mulf %226, %12 : vector<8x16xf32>
    %228 = arith.addf %224, %227 : vector<8x16xf32>
    %c6_127 = arith.constant 6 : index
    %c0_128 = arith.constant 0 : index
    %229 = vector.load %arg4[%c6_127, %c0_128] : memref<8x16xf32, #tpu.memory_space<vmem>>, vector<1x16xf32>
    %230 = vector.broadcast %229 : vector<1x16xf32> to vector<8x16xf32>
    %231 = arith.addf %228, %230 : vector<8x16xf32>
    %cst_129 = arith.constant 0.000000e+00 : f32
    %232 = vector.broadcast %cst_129 : f32 to vector<8x16xf32>
    %233 = arith.subf %232, %231 : vector<8x16xf32>
    %234 = math.exp %233 : vector<8x16xf32>
    %cst_130 = arith.constant 1.000000e+00 : f32
    %235 = vector.broadcast %cst_130 : f32 to vector<8x16xf32>
    %236 = arith.addf %235, %234 : vector<8x16xf32>
    %237 = tpu.reciprocal %236 {approx = true} : vector<8x16xf32> -> vector<8x16xf32>
    %238 = arith.mulf %231, %237 : vector<8x16xf32>
    %c0_131 = arith.constant 0 : index
    %c0_132 = arith.constant 0 : index
    %c0_133 = arith.constant 0 : index
    %239 = vector.load %arg6[%c0_131, %c0_132, %c0_133] : memref<2x16x8xf32, #tpu.memory_space<vmem>>, vector<1x16x8xf32>
    %240 = vector.shape_cast %239 : vector<1x16x8xf32> to vector<16x8xf32>
    %cst_134 = arith.constant dense<0.000000e+00> : vector<16x16xf32>
    %241 = tpu.matmul %240, %238, %cst_134 {dimension_numbers = #tpu.dot_dimension_numbers<[1], [0], [0], [1], [0, 0, 1, 1], [], []>} : vector<16x8xf32>, vector<8x16xf32>, vector<16x16xf32> -> vector<16x16xf32>
    %242 = arith.addf %211, %241 : vector<16x16xf32>
    %cst_135 = arith.constant 0.000000e+00 : f32
    %243 = vector.broadcast %cst_135 : f32 to vector<8x16xf32>
    %c28 = arith.constant 28 : index
    %c0_136 = arith.constant 0 : index
    %244 = vector.load %arg3[%c28, %c0_136] : memref<32x16xf32, #tpu.memory_space<vmem>>, vector<1x16xf32>
    %245 = vector.broadcast %244 : vector<1x16xf32> to vector<8x16xf32>
    %246 = arith.mulf %245, %3 : vector<8x16xf32>
    %247 = arith.addf %243, %246 : vector<8x16xf32>
    %c29 = arith.constant 29 : index
    %c0_137 = arith.constant 0 : index
    %248 = vector.load %arg3[%c29, %c0_137] : memref<32x16xf32, #tpu.memory_space<vmem>>, vector<1x16xf32>
    %249 = vector.broadcast %248 : vector<1x16xf32> to vector<8x16xf32>
    %250 = arith.mulf %249, %6 : vector<8x16xf32>
    %251 = arith.addf %247, %250 : vector<8x16xf32>
    %c30 = arith.constant 30 : index
    %c0_138 = arith.constant 0 : index
    %252 = vector.load %arg3[%c30, %c0_138] : memref<32x16xf32, #tpu.memory_space<vmem>>, vector<1x16xf32>
    %253 = vector.broadcast %252 : vector<1x16xf32> to vector<8x16xf32>
    %254 = arith.mulf %253, %9 : vector<8x16xf32>
    %255 = arith.addf %251, %254 : vector<8x16xf32>
    %c31 = arith.constant 31 : index
    %c0_139 = arith.constant 0 : index
    %256 = vector.load %arg3[%c31, %c0_139] : memref<32x16xf32, #tpu.memory_space<vmem>>, vector<1x16xf32>
    %257 = vector.broadcast %256 : vector<1x16xf32> to vector<8x16xf32>
    %258 = arith.mulf %257, %12 : vector<8x16xf32>
    %259 = arith.addf %255, %258 : vector<8x16xf32>
    %c7_140 = arith.constant 7 : index
    %c0_141 = arith.constant 0 : index
    %260 = vector.load %arg4[%c7_140, %c0_141] : memref<8x16xf32, #tpu.memory_space<vmem>>, vector<1x16xf32>
    %261 = vector.broadcast %260 : vector<1x16xf32> to vector<8x16xf32>
    %262 = arith.addf %259, %261 : vector<8x16xf32>
    %cst_142 = arith.constant 0.000000e+00 : f32
    %263 = vector.broadcast %cst_142 : f32 to vector<8x16xf32>
    %264 = arith.subf %263, %262 : vector<8x16xf32>
    %265 = math.exp %264 : vector<8x16xf32>
    %cst_143 = arith.constant 1.000000e+00 : f32
    %266 = vector.broadcast %cst_143 : f32 to vector<8x16xf32>
    %267 = arith.addf %266, %265 : vector<8x16xf32>
    %268 = tpu.reciprocal %267 {approx = true} : vector<8x16xf32> -> vector<8x16xf32>
    %269 = arith.mulf %262, %268 : vector<8x16xf32>
    %c1_144 = arith.constant 1 : index
    %c0_145 = arith.constant 0 : index
    %c0_146 = arith.constant 0 : index
    %270 = vector.load %arg6[%c1_144, %c0_145, %c0_146] : memref<2x16x8xf32, #tpu.memory_space<vmem>>, vector<1x16x8xf32>
    %271 = vector.shape_cast %270 : vector<1x16x8xf32> to vector<16x8xf32>
    %cst_147 = arith.constant dense<0.000000e+00> : vector<16x16xf32>
    %272 = tpu.matmul %271, %269, %cst_147 {dimension_numbers = #tpu.dot_dimension_numbers<[1], [0], [0], [1], [0, 0, 1, 1], [], []>} : vector<16x8xf32>, vector<8x16xf32>, vector<16x16xf32> -> vector<16x16xf32>
    %273 = arith.addf %242, %272 : vector<16x16xf32>
    %c0_148 = arith.constant 0 : index
    %c3_149 = arith.constant 3 : index
    %c0_150 = arith.constant 0 : index
    %c0_151 = arith.constant 0 : index
    %c0_152 = arith.constant 0 : index
    %274 = vector.load %arg7[%c0_148, %c3_149, %c0_150, %c0_151, %c0_152] : memref<1x4x1x16x16xf32, #tpu.memory_space<vmem>>, vector<1x1x1x16x16xf32>
    %275 = vector.shape_cast %274 : vector<1x1x1x16x16xf32> to vector<16x16xf32>
    %276 = vector.shape_cast %273 : vector<16x16xf32> to vector<1x1x1x16x16xf32>
    tpu.vector_store %arg7[%c0_148, %c3_149, %c0_150, %c0_151, %c0_152], %276 {strides = array<i32>} : memref<1x4x1x16x16xf32, #tpu.memory_space<vmem>>, vector<1x1x1x16x16xf32>,
    return
  }
  func.func @transform_0(%arg0: i32, %arg1: i32) -> (i32, i32, i32, i32, i32) {
    %c0_i32 = arith.constant 0 : i32
    %c0_i32_0 = arith.constant 0 : i32
    %c0_i32_1 = arith.constant 0 : i32
    %c0_i32_2 = arith.constant 0 : i32
    return %arg0, %c0_i32, %arg1, %c0_i32_0, %c0_i32_1 : i32, i32, i32, i32, i32
  }
  func.func @transform_1(%arg0: i32, %arg1: i32) -> (i32, i32) {
    %c0_i32 = arith.constant 0 : i32
    %c0_i32_0 = arith.constant 0 : i32
    %c0_i32_1 = arith.constant 0 : i32
    return %c0_i32, %c0_i32_0 : i32, i32
  }
  func.func @transform_2(%arg0: i32, %arg1: i32) -> (i32, i32) {
    %c0_i32 = arith.constant 0 : i32
    %c0_i32_0 = arith.constant 0 : i32
    %c0_i32_1 = arith.constant 0 : i32
    return %c0_i32, %c0_i32_0 : i32, i32
  }
  func.func @transform_3(%arg0: i32, %arg1: i32) -> (i32, i32) {
    %c0_i32 = arith.constant 0 : i32
    %c0_i32_0 = arith.constant 0 : i32
    %c0_i32_1 = arith.constant 0 : i32
    return %c0_i32, %c0_i32_0 : i32, i32
  }
  func.func @transform_4(%arg0: i32, %arg1: i32) -> (i32, i32, i32) {
    %c0_i32 = arith.constant 0 : i32
    %c0_i32_0 = arith.constant 0 : i32
    %c0_i32_1 = arith.constant 0 : i32
    %c0_i32_2 = arith.constant 0 : i32
    return %c0_i32, %c0_i32_0, %c0_i32_1 : i32, i32, i32
  }
  func.func @transform_5(%arg0: i32, %arg1: i32) -> (i32, i32, i32, i32, i32) {
    %c0_i32 = arith.constant 0 : i32
    %c0_i32_0 = arith.constant 0 : i32
    %c0_i32_1 = arith.constant 0 : i32
    %c0_i32_2 = arith.constant 0 : i32
    return %arg0, %c0_i32, %arg1, %c0_i32_0, %c0_i32_1 : i32, i32, i32, i32, i32
  }
}

</mosaic_0001>

<bundles_post_ra>
// kernel: pixel_shuffle_upsample.1
= control target key start
LH: loop header
LB: loop body
LE: loop exit
PB: predicated region body
PF: predicated region fallthrough
CT: control target
= control target key end

     0   :  { %s1659_s0 = inlined_call_operand.vmem [shape: f32[2,4,3,8,8], index: 0, kind: input, shape index: {}]   ;;  %s1660_s1 = inlined_call_operand.vmem [shape: f32[32,16], index: 1, kind: input, shape index: {}]   ;;  %s1661_s2 = inlined_call_operand.vmem [shape: f32[8,16], index: 2, kind: input, shape index: {}]   ;;  %s1662_s3 = inlined_call_operand.vmem [shape: f32[8,16], index: 3, kind: input, shape index: {}]   ;;  %s1663_s4 = inlined_call_operand.vmem [shape: f32[2,16,8], index: 4, kind: input, shape index: {}]   ;;  %s1664_s5 = inlined_call_operand.hbm [shape: f32[2,4,3,16,16], index: 5, kind: output, shape index: {}]  }
   0x1   :  { %1665 = sst [smem:[#allocation8_spill]] %s1659_s0 }
   0x2   :  { %10 = vsyncpa [#allocation4], 0 }
   0x3   :  { %12 = vsyncpa [#allocation4 + $0x1], 0  ;;  %s1289_s18 = smov 0   ;;  %s1291_s19 = smov 0  }
   0x4   :  { %s1293_s20 = smov 0   ;;  %s1295_s21 = smov 0  }
   0x5   :  { %s1297_s22 = smov 0   ;;  %s1299_s23 = smov 0  }
   0x6   :  { %s1301_s24 = smov 0   ;;  %s1303_s25 = smov 0  }
   0x7 LB: > { %s975_s26 = sadd.s32 4294967295, %s1250_s25   ;;  %s976_s27 = sadd.s32 4294967294, %s1250_s25   ;;  %s1250_s25 = sphi %s1303_s25, %s18_s25   ;;  %s1246_s24 = sphi %s1301_s24, %s1676_s24   ;;  %s1242_s23 = sphi %s1299_s23, %s1675_s23   ;;  %s1238_s22 = sphi %s1297_s22, %s1674_s22   ;;  %s1234_s21 = sphi %s1295_s21, %s1673_s21   ;;  %s1230_s20 = sphi %s1293_s20, %s1672_s20   ;;  %s1226_s19 = sphi %s1291_s19, %s1671_s19   ;;  %s1222_s18 = sphi %s1289_s18, %s1670_s18  }
   0x8   : > { %s27_s28 = sadd.s32 1, %s1242_s23  ;;  %s30_s29 = sadd.s32 1, %s1246_s24 }
   0x9   : > { %p28_p0 = scmp.ge.s32.totalorder %s27_s28, 3  ;;  %p46_p1 = scmp.ne.s32.totalorder %s1230_s20, %s1226_s19 }
   0xa   : > { %p47_p2 = scmp.eq.s32.totalorder %s1250_s25, 0  ;;  %p162_p5 = scmp.eq.s32.totalorder %s975_s26, 5 }
   0xb   : > { %s1678_s28 = smov (%p28_p0, %s27_s28), 0  ;;  %s1680_s29 = smov (!%p28_p0, %s30_s29), %s1246_s24 }
   0xc   : > { %s35_s30 = ssub.s32 %s1242_s23, %s1678_s28  ;;  %p1341_p3 = por %p47_p2, %p46_p1 }
   0xd   : > { %p32_p4 = scmp.ge.s32.totalorder %s1680_s29, 2  ;;  %p167_p6 = scmp.ne.s32.totalorder %s1226_s19, %s1222_s18 }
   0xe   : > { %p168_p7 = scmp.eq.s32.totalorder %s976_s27, 5  ;;  %p1349_p8 = por %p162_p5, %p46_p1 }
   0xf   : > { %s1682_s29 = smov (%p32_p4, %s1680_s29), 0  ;;  %s39_s11 = sadd.s32 1, %s1230_s20 }
  0x10   : > { %p1353_p9 = por %p168_p7, %p167_p6  ;;  %s34_s9 = ssub.s32 %s1246_s24, %s1682_s29 }
  0x11   : > { %s36_s10 = sor.u32 %s35_s30, %s34_s9  ;;  %p978_p11 = scmp.ge.s32.totalorder %s1250_s25, 6 }
  0x12   : > { %p37_p10 = scmp.eq.s32.totalorder %s36_s10, 0 }
  0x13   : > { %196 = sbr.rel (%p978_p11) target bundleno = 38 (0x26), region = 32 }
  0x14   : > { %s1361_s12 = scalar_select %p37_p10, %s1230_s20, %s39_s11  }
  0x18   : > { %199 = sbr.rel (!%p1341_p3) target bundleno = 38 (0x26), region = 36  ;;  %s201_s13 = sand.u32 (%p1341_p3), 1, %s1230_s20  }
  0x19   : > { %s1026_s14 = smul.u32 (%p1341_p3), 12, %s1246_s24  ;;  %s979_s15 = sshll.u32 (%p1341_p3), %s201_s13, 5 }
  0x1a   : > { %s1669_s0 = sld [smem:[#allocation8_spill]] (%p1341_p3)  ;;  %s203_s9 = scalar_lea.vmem (%p1341_p3), [#allocation2], %s979_s15 }
  0x1b   : > { %s205_s16 = sadd.s32 (%p1341_p3), %s1242_s23, %s1026_s14 }
  0x1c   : > { %s980_s17 = sshll.u32 (%p1341_p3), %s205_s16, 3 }
  0x20   : > { %s207_s30 = scalar_lea.vmem %s1669_s0, %s980_s17 }
  0x21   : > { %v242_v0 = vld [vmem:[%s207_s30] sm:$0xff]  ;;  %v244_v1 = vld [vmem:[%s207_s30 + $0x18] sm:$0xff]  ;;  %v246_v2 = vld [vmem:[%s207_s30 + $0x30] sm:$0xff] }
  0x22   : > { %243 = vst [vmem:[%s203_s9] sm:$0xff] %v242_v0  ;;  %v248_v3 = vld [vmem:[%s207_s30 + $0x48] sm:$0xff] }
  0x23   : > { %245 = vst [vmem:[%s203_s9 + $0x8] sm:$0xff] %v244_v1 }
  0x24   : > { %247 = vst [vmem:[%s203_s9 + $0x10] sm:$0xff] %v246_v2 }
  0x25   : > { %249 = vst [vmem:[%s203_s9 + $0x18] sm:$0xff] %v248_v3 }
  0x26 PF: > { %p981_p12 = scmp.ge.s32.totalorder %s1250_s25, 1  ;;  %p254_p13 = scmp.lt.s32.totalorder %s1250_s25, 7 }
  0x28   : > { %p255_p0 = pnand %p981_p12, %p254_p13 }
  0x29   : > { %s1378_s11 = sand.u32 (!%p255_p0), 1, %s1226_s19  }
  0x2a   : > { %258 = sbr.rel (%p255_p0) target bundleno = 386 (0x182), region = 74  ;;  %s982_s13 = sshll.u32 (!%p255_p0), %s1378_s11, 5 }
  0x2b   : > { %s263_s14 = scalar_lea.vmem (!%p255_p0), [#allocation2], %s982_s13  ;;  %s983_s27 = sshll.u32 (!%p255_p0), %s1378_s11, 6 }
  0x2c   : > { %s1592_s30 = scalar_lea.vmem (!%p255_p0), [#allocation3], %s983_s27  ;;  %s851_s9 = scalar_lea.sflag (!%p255_p0), [#allocation4], %s1378_s11 }
  0x2f   : > { %v288_v4 = vld [vmem:[%s1662_s3] sm:$0xff]  ;;  %vm290_vm0 = vcmask 64512   ;;  %v987_v5 = vld [vmem:[%s263_s14 + $0x10] sm:$0xff]  ;;  %v989_v6 = vld [vmem:[%s263_s14 + $0x18] sm:$0xff]  ;;  %vm502_vm1 = vcmask 130048  }
  0x30   : > { %359 = vmatpush.msra.mxu2 %v288_v4  ;;  %384 = vmatpush.msra.mxu3 %v288_v4  ;;  %v289_v7 = vld [vmem:[%s263_s14] sm:$0xff]  ;;  %v985_v8 = vld [vmem:[%s263_s14 + $0x8] sm:$0xff]  ;;  %v1132_v17 = vld [vmem:[%s1660_s1 + $0x14] ss:$0 sm:$0xff] }
  0x31   : > { %309 = vmatpush.msra.mxu0 %v288_v4  ;;  %334 = vmatpush.msra.mxu1 %v288_v4  ;;  %v1112_v9 = vld [vmem:[%s1660_s1 + $0x4] ss:$0 sm:$0xff]  ;;  %v1113_v10 = vld [vmem:[%s1660_s1 + $0x5] ss:$0 sm:$0xff]  ;;  %v1117_v11 = vld [vmem:[%s1660_s1] ss:$0 sm:$0xff] }
  0x32   : > { %988 = vmatmul.msk.f32.vlgmr.msra.gmra.mxu2 %vm290_vm0, %v987_v5  ;;  %990 = vmatmul.msk.f32.vlgmr.msra.gmra.mxu3 %vm290_vm0, %v989_v6  ;;  %v1118_v12 = vld [vmem:[%s1660_s1 + $0x1] ss:$0 sm:$0xff]  ;;  %v1122_v13 = vld [vmem:[%s1660_s1 + $0xc] ss:$0 sm:$0xff]  ;;  %v1123_v14 = vld [vmem:[%s1660_s1 + $0xd] ss:$0 sm:$0xff] }
  0x33   : > { %984 = vmatmul.msk.f32.vlgmr.msra.gmra.mxu0 %vm290_vm0, %v289_v7  ;;  %986 = vmatmul.msk.f32.vlgmr.msra.gmra.mxu1 %vm290_vm0, %v985_v8  ;;  %v1127_v15 = vld [vmem:[%s1660_s1 + $0x8] ss:$0 sm:$0xff]  ;;  %v1128_v16 = vld [vmem:[%s1660_s1 + $0x9] ss:$0 sm:$0xff]  ;;  %v1133_v18 = vld [vmem:[%s1660_s1 + $0x15] ss:$0 sm:$0xff] }
  0x34   : > { %v1114_v21 = vld [vmem:[%s1660_s1 + $0x6] ss:$0 sm:$0xff]  ;;  %v1119_v22 = vld [vmem:[%s1660_s1 + $0x2] ss:$0 sm:$0xff]  ;;  %v1137_v23 = vld [vmem:[%s1660_s1 + $0x10] ss:$0 sm:$0xff] }
  0x35   : > { %v1138_v24 = vld [vmem:[%s1660_s1 + $0x11] ss:$0 sm:$0xff]  ;;  %v1142_v29 = vld [vmem:[%s1660_s1 + $0x1c] ss:$0 sm:$0xff]  ;;  %v1143_v30 = vld [vmem:[%s1660_s1 + $0x1d] ss:$0 sm:$0xff] }
  0x36   : > { %v1147_v31 = vld [vmem:[%s1660_s1 + $0x18] ss:$0 sm:$0xff]  ;;  %v1115_v32 = vld [vmem:[%s1660_s1 + $0x7] ss:$0 sm:$0xff]  ;;  %v1120_v33 = vld [vmem:[%s1660_s1 + $0x3] ss:$0 sm:$0xff] }
  0x37   : > { %v1124_v36 = vld [vmem:[%s1660_s1 + $0xe] ss:$0 sm:$0xff]  ;;  %v1125_v41 = vld [vmem:[%s1660_s1 + $0xf] ss:$0 sm:$0xff]  ;;  %v1129_v42 = vld [vmem:[%s1660_s1 + $0xa] ss:$0 sm:$0xff] }
  0x38   : > { %v1130_v43 = vld [vmem:[%s1660_s1 + $0xb] ss:$0 sm:$0xff]  ;;  %v1134_v48 = vld [vmem:[%s1660_s1 + $0x16] ss:$0 sm:$0xff]  ;;  %v1135_v49 = vld [vmem:[%s1660_s1 + $0x17] ss:$0 sm:$0xff] }
  0x39   : > { %v1139_v55 = vld [vmem:[%s1660_s1 + $0x12] ss:$0 sm:$0xff]  ;;  %v1140_v63 = vld [vmem:[%s1660_s1 + $0x13] ss:$0 sm:$0xff]  ;;  %v1116_v5 = vld [vmem:[%s1661_s2 + $0x1] ss:$0 sm:$0xff] }
  0x3a   : > { %v1121_v7 = vld [vmem:[%s1661_s2] ss:$0 sm:$0xff] }
  0xb0   : > { %v311_v19 = vpop.f32.mrf.mxu0  ;;  %v1415_v20 = vpop.f32.mrf.mxu1 }
  0xb1   : > { %v418_v25 = vmul.f32 %v1112_v9, %v311_v19  ;;  %v422_v26 = vmul.f32 %v1113_v10, %v1415_v20  ;;  %v391_v27 = vmul.f32 %v1117_v11, %v311_v19  ;;  %v395_v28 = vmul.f32 %v1118_v12, %v1415_v20  ;;  %v1144_v10 = vld [vmem:[%s1660_s1 + $0x1e] ss:$0 sm:$0xff]  ;;  %v1126_v12 = vld [vmem:[%s1661_s2 + $0x3] ss:$0 sm:$0xff] }
  0xb2   : > { %v534_v34 = vmul.f32 %v1122_v13, %v311_v19  ;;  %v538_v35 = vmul.f32 %v1123_v14, %v1415_v20  ;;  %v507_v37 = vmul.f32 %v1127_v15, %v311_v19  ;;  %v511_v38 = vmul.f32 %v1128_v16, %v1415_v20  ;;  %v1131_v14 = vld [vmem:[%s1661_s2 + $0x2] ss:$0 sm:$0xff] }
  0xb3   : > { %v423_v39 = vadd.f32 %v422_v26, %v418_v25  ;;  %v396_v40 = vadd.f32 %v395_v28, %v391_v27  ;;  %v649_v44 = vmul.f32 %v1132_v17, %v311_v19  ;;  %v653_v45 = vmul.f32 %v1133_v18, %v1415_v20  ;;  %v1145_v17 = vld [vmem:[%s1660_s1 + $0x1f] ss:$0 sm:$0xff]  ;;  %v1141_v27 = vld [vmem:[%s1661_s2 + $0x4] ss:$0 sm:$0xff] }
  0xb4   : > { %v539_v46 = vadd.f32 %v538_v35, %v534_v34  ;;  %v512_v47 = vadd.f32 %v511_v38, %v507_v37  ;;  %v622_v50 = vmul.f32 %v1137_v23, %v311_v19  ;;  %v626_v51 = vmul.f32 %v1138_v24, %v1415_v20 }
  0xb5   : > { %v1468_v52 = vpop.f32.mrf.mxu2  ;;  %v1470_v53 = vpop.f32.mrf.mxu3  ;;  %v654_v54 = vadd.f32 %v653_v45, %v649_v44  ;;  %v764_v56 = vmul.f32 %v1142_v29, %v311_v19  ;;  %v768_v57 = vmul.f32 %v1143_v30, %v1415_v20  ;;  %v737_v58 = vmul.f32 %v1147_v31, %v311_v19  ;;  %v1148_v29 = vld [vmem:[%s1660_s1 + $0x19] ss:$0 sm:$0xff] }
  0xb6   : > { %v426_v59 = vmul.f32 %v1114_v21, %v1468_v52  ;;  %v430_v60 = vmul.f32 %v1115_v32, %v1470_v53  ;;  %v399_v61 = vmul.f32 %v1119_v22, %v1468_v52  ;;  %v403_v62 = vmul.f32 %v1120_v33, %v1470_v53  ;;  %v1136_v22 = vld [vmem:[%s1661_s2 + $0x5] ss:$0 sm:$0xff] }
  0xb7   : > { %v542_v0 = vmul.f32 %v1124_v36, %v1468_v52  ;;  %v546_v1 = vmul.f32 %v1125_v41, %v1470_v53  ;;  %v515_v2 = vmul.f32 %v1129_v42, %v1468_v52  ;;  %v519_v3 = vmul.f32 %v1130_v43, %v1470_v53  ;;  %v1146_v42 = vld [vmem:[%s1661_s2 + $0x7] ss:$0 sm:$0xff]  ;;  %v1149_v43 = vld [vmem:[%s1660_s1 + $0x1a] ss:$0 sm:$0xff] }
  0xb8   : > { %v427_v4 = vadd.f32 %v426_v59, %v423_v39  ;;  %v400_v6 = vadd.f32 %v399_v61, %v396_v40  ;;  %v657_v8 = vmul.f32 %v1134_v48, %v1468_v52  ;;  %v661_v9 = vmul.f32 %v1135_v49, %v1470_v53  ;;  %v1150_v48 = vld [vmem:[%s1660_s1 + $0x1b] ss:$0 sm:$0xff] }
  0xb9   : > { %v543_v11 = vadd.f32 %v542_v0, %v539_v46  ;;  %v516_v13 = vadd.f32 %v515_v2, %v512_v47  ;;  %v627_v15 = vadd.f32 %v626_v51, %v622_v50  ;;  %v630_v16 = vmul.f32 %v1139_v55, %v1468_v52  ;;  %v1151_v2 = vld [vmem:[%s1661_s2 + $0x6] ss:$0 sm:$0xff] }
  0xba   : > { %v431_v18 = vadd.f32 %v430_v60, %v427_v4  ;;  %v404_v19 = vadd.f32 %v403_v62, %v400_v6  ;;  %v658_v21 = vadd.f32 %v657_v8, %v654_v54  ;;  %v634_v23 = vmul.f32 %v1140_v63, %v1470_v53 }
  0xbb   : > { %v547_v24 = vadd.f32 %v546_v1, %v543_v11  ;;  %v520_v25 = vadd.f32 %v519_v3, %v516_v13  ;;  %v631_v26 = vadd.f32 %v630_v16, %v627_v15  ;;  %v769_v28 = vadd.f32 %v768_v57, %v764_v56 }
  0xbc   : > { %v1518_v30 = vadd.f32 %v1116_v5, %v431_v18  ;;  %v1520_v31 = vadd.f32 %v1121_v7, %v404_v19  ;;  %v662_v32 = vadd.f32 %v661_v9, %v658_v21  ;;  %v772_v33 = vmul.f32 %v1144_v10, %v1468_v52 }
  0xbd   : > { %v1523_v34 = vadd.f32 %v1126_v12, %v547_v24  ;;  %v1525_v35 = vadd.f32 %v1131_v14, %v520_v25  ;;  %v635_v36 = vadd.f32 %v634_v23, %v631_v26  ;;  %v776_v37 = vmul.f32 %v1145_v17, %v1470_v53 }
  0xbe   : > { %v435_v38 = vsub.f32 0.0, %v1518_v30  ;;  %v408_v39 = vsub.f32 0.0, %v1520_v31  ;;  %v1530_v40 = vadd.f32 %v1136_v22, %v662_v32  ;;  %v773_v41 = vadd.f32 %v772_v33, %v769_v28 }
  0xbf   : > { %v551_v44 = vsub.f32 0.0, %v1523_v34  ;;  %v524_v45 = vsub.f32 0.0, %v1525_v35  ;;  %v1540_v46 = vadd.f32 %v1141_v27, %v635_v36  ;;  %v741_v47 = vmul.f32 %v1148_v29, %v1415_v20  ;;  %v997_v27 = vld [vmem:[%s1663_s4 + $0x10] sm:$0xff] }
  0xc0   : > { %v436_v49 = vmul.f32 1.442695, %v435_v38  ;;  %v409_v50 = vmul.f32 1.442695, %v408_v39  ;;  %v666_v51 = vsub.f32 0.0, %v1530_v40  ;;  %v777_v54 = vadd.f32 %v776_v37, %v773_v41  ;;  %v998_v38 = vld [vmem:[%s1663_s4 + $0x18] sm:$0xff] }
  0xc1   : > { %v552_v55 = vmul.f32 1.442695, %v551_v44  ;;  %v525_v56 = vmul.f32 1.442695, %v524_v45  ;;  %v639_v57 = vsub.f32 0.0, %v1540_v46  ;;  %v742_v59 = vadd.f32 %v741_v47, %v737_v58  ;;  %v531_v39 = vld [vmem:[%s1663_s4 + $0x8] sm:$0xff] }
  0xc2   : > { %1152 = vpow2.f32 %v436_v49  ;;  %v667_v60 = vmul.f32 1.442695, %v666_v51  ;;  %v1548_v61 = vadd.f32 %v1146_v42, %v777_v54  ;;  %v745_v20 = vmul.f32 %v1149_v43, %v1468_v52 }
  0xc3   : > { %1154 = vpow2.f32 %v409_v50  ;;  %v640_v62 = vmul.f32 1.442695, %v639_v57  ;;  %v749_v63 = vmul.f32 %v1150_v48, %v1470_v53 }
  0xc4   : > { %1156 = vpow2.f32 %v552_v55  ;;  %v781_v0 = vsub.f32 0.0, %v1548_v61  ;;  %v746_v1 = vadd.f32 %v745_v20, %v742_v59 }
  0xc5   : > { %1158 = vpow2.f32 %v525_v56 }
  0xc6   : > { %1160 = vpow2.f32 %v667_v60  ;;  %v782_v58 = vmul.f32 1.442695, %v781_v0  ;;  %v750_v3 = vadd.f32 %v749_v63, %v746_v1 }
  0xc7   : > { %1162 = vpow2.f32 %v640_v62 }
  0xc8   : > { %v1153_v4 = vpop.eup %1152  ;;  %1164 = vpow2.f32 %v782_v58  ;;  %v753_v52 = vadd.f32 %v1151_v2, %v750_v3 }
  0xc9   : > { %v1155_v5 = vpop.eup %1154  ;;  %v438_v6 = vadd.f32 1.0, %v1153_v4 }
  0xca   : > { %v1157_v7 = vpop.eup %1156  ;;  %v411_v53 = vadd.f32 1.0, %v1155_v5  ;;  %v754_v8 = vsub.f32 0.0, %v753_v52 }
  0xcb   : > { %v1159_v9 = vpop.eup %1158  ;;  %1166 = vrcp.f32 %v438_v6  ;;  %v554_v10 = vadd.f32 1.0, %v1157_v7 }
  0xcc   : > { %v1161_v11 = vpop.eup %1160  ;;  %1168 = vrcp.f32 %v411_v53  ;;  %v527_v12 = vadd.f32 1.0, %v1159_v9  ;;  %v755_v17 = vmul.f32 1.442695, %v754_v8 }
  0xcd   : > { %v1163_v13 = vpop.eup %1162  ;;  %1170 = vrcp.f32 %v554_v10  ;;  %v669_v14 = vadd.f32 1.0, %v1161_v11 }
  0xce   : > { %v1165_v15 = vpop.eup %1164  ;;  %1172 = vrcp.f32 %v527_v12  ;;  %v642_v16 = vadd.f32 1.0, %v1163_v13 }
  0xcf   : > { %1174 = vrcp.f32 %v669_v14  ;;  %v784_v18 = vadd.f32 1.0, %v1165_v15 }
  0xd0   : > { %1176 = vrcp.f32 %v642_v16 }
  0xd1   : > { %v1167_v19 = vpop.eup %1166  ;;  %1178 = vrcp.f32 %v784_v18 }
  0xd2   : > { %v1169_v21 = vpop.eup %1168  ;;  %v440_v22 = vmul.f32 %v1167_v19, %v1518_v30  ;;  %1180 = vpow2.f32 %v755_v17  ;;  %v530_v30 = vld [vmem:[%s1663_s4] sm:$0xff] }
  0xd3   : > { %v1171_v23 = vpop.eup %1170  ;;  %v413_v24 = vmul.f32 %v1169_v21, %v1520_v31 }
  0xd4   : > { %v1173_v25 = vpop.eup %1172  ;;  %465 = vmatpush.msrb.mxu0 %v440_v22  ;;  %v556_v26 = vmul.f32 %v1171_v23, %v1523_v34 }
  0xd5   : > { %v1175_v28 = vpop.eup %1174  ;;  %494 = vmatpush.msrb.mxu1 %v413_v24  ;;  %v529_v29 = vmul.f32 %v1173_v25, %v1525_v35  ;;  %993 = vmatmul.msk.f32.vlgmr.msrb.gmra.mxu0 %vm290_vm0, %v997_v27 }
  0xd6   : > { %v1177_v32 = vpop.eup %1176  ;;  %580 = vmatpush.msrb.mxu2 %v556_v26  ;;  %v671_v31 = vmul.f32 %v1175_v28, %v1530_v40  ;;  %995 = vmatmul.msk.f32.vlgmr.msrb.gmra.mxu1 %vm290_vm0, %v530_v30 }
  0xd7   : > { %v1179_v33 = vpop.eup %1178  ;;  %609 = vmatpush.msrb.mxu3 %v529_v29  ;;  %v644_v34 = vmul.f32 %v1177_v32, %v1540_v46  ;;  %999 = vmatmul.msk.f32.vlgmr.msrb.gmra.mxu2 %vm290_vm0, %v997_v27 }
  0xd8   : > { %v1181_v36 = vpop.eup %1180  ;;  %695 = vmatpush.msra.mxu0 %v671_v31  ;;  %v786_v35 = vmul.f32 %v1179_v33, %v1548_v61  ;;  %1001 = vmatmul.msk.f32.vlgmr.msrb.gmra.mxu3 %vm290_vm0, %v530_v30 }
  0xd9   : > { %724 = vmatpush.msra.mxu1 %v644_v34  ;;  %v757_v37 = vadd.f32 1.0, %v1181_v36 }
  0xda   : > { %810 = vmatpush.msra.mxu2 %v786_v35 }
  0xdb   : > { %1182 = vrcp.f32 %v757_v37 }
  0xdd   : > { %994 = vmatmul.msk.f32.gmra.mxu0 %vm290_vm0, %v998_v38 }
  0xde   : > { %996 = vmatmul.msk.f32.gmra.mxu1 %vm290_vm0, %v531_v39 }
  0xdf   : > { %1000 = vmatmul.msk.f32.gmra.mxu2 %vm290_vm0, %v998_v38 }
  0xe0   : > { %1002 = vmatmul.msk.f32.gmra.mxu3 %vm290_vm0, %v531_v39 }
  0xe1   : > { %v1183_v40 = vpop.eup %1182 }
  0xe2   : > { %v759_v41 = vmul.f32 %v1183_v40, %v753_v52 }
  0xe4   : > { %839 = vmatpush.msra.mxu3 %v759_v41 }
  0xe5   : > { %1007 = vmatmul.msk.f32.vlgmr.msra.gmra.mxu0 %vm290_vm0, %v997_v27 }
  0xe6   : > { %1009 = vmatmul.msk.f32.vlgmr.msra.gmra.mxu1 %vm290_vm0, %v530_v30 }
  0xe7   : > { %1015 = vmatmul.msk.f32.vlgmr.msra.gmra.mxu2 %vm290_vm0, %v997_v27 }
  0xe8   : > { %1017 = vmatmul.msk.f32.vlgmr.msra.gmra.mxu3 %vm290_vm0, %v530_v30 }
  0xed   : > { %1008 = vmatmul.msk.f32.gmra.mxu0 %vm290_vm0, %v998_v38 }
  0xee   : > { %1010 = vmatmul.msk.f32.gmra.mxu1 %vm290_vm0, %v531_v39 }
  0xef   : > { %1016 = vmatmul.msk.f32.gmra.mxu2 %vm290_vm0, %v998_v38 }
  0xf0   : > { %1018 = vmatmul.msk.f32.gmra.mxu3 %vm290_vm0, %v531_v39 }
 0x152   : > { %v467_v42 = vpop.f32.mrf.mxu0 }
 0x153   : > { %v496_v43 = vpop.f32.mrf.mxu1 }
 0x154   : > { %v497_v44 = vadd.f32 %v496_v43, %v467_v42 }
 0x156   : > { %503 = vst.msk [vmem:[%s1592_s30] sm:$0xff] %vm502_vm1, %v497_v44 }
 0x15a   : > { %v582_v45 = vpop.f32.mrf.mxu2  ;;  %v470_v46 = vpop.f32.mrf.mxu0 }
 0x15b   : > { %v611_v47 = vpop.f32.mrf.mxu3  ;;  %v499_v48 = vpop.f32.mrf.mxu1 }
 0x15c   : > { %v612_v49 = vadd.f32 %v611_v47, %v582_v45  ;;  %v500_v50 = vadd.f32 %v499_v48, %v470_v46 }
 0x15e   : > { %1003 = vst.msk [vmem:[%s1592_s30 + $0x10] sm:$0xff] %vm502_vm1, %v612_v49 }
 0x15f   : > { %504 = vst.msk [vmem:[%s1592_s30 + $0x8] sm:$0xff] %vm502_vm1, %v500_v50 }
 0x162   : > { %v585_v51 = vpop.f32.mrf.mxu2  ;;  %v697_v54 = vpop.f32.mrf.mxu0 }
 0x163   : > { %v614_v55 = vpop.f32.mrf.mxu3  ;;  %v726_v56 = vpop.f32.mrf.mxu1 }
 0x164   : > { %v615_v57 = vadd.f32 %v614_v55, %v585_v51  ;;  %v727_v59 = vadd.f32 %v726_v56, %v697_v54 }
 0x166   : > { %1004 = vst.msk [vmem:[%s1592_s30 + $0x18] sm:$0xff] %vm502_vm1, %v615_v57 }
 0x167   : > { %1011 = vst.msk [vmem:[%s1592_s30 + $0x20] sm:$0xff] %vm502_vm1, %v727_v59 }
 0x16a   : > { %v812_v60 = vpop.f32.mrf.mxu2  ;;  %v700_v61 = vpop.f32.mrf.mxu0 }
 0x16b   : > { %v841_v20 = vpop.f32.mrf.mxu3  ;;  %v729_v62 = vpop.f32.mrf.mxu1 }
 0x16c   : > { %v842_v63 = vadd.f32 %v841_v20, %v812_v60  ;;  %v730_v0 = vadd.f32 %v729_v62, %v700_v61 }
 0x16e   : > { %1019 = vst.msk [vmem:[%s1592_s30 + $0x30] sm:$0xff] %vm502_vm1, %v842_v63 }
 0x16f   : > { %1012 = vst.msk [vmem:[%s1592_s30 + $0x28] sm:$0xff] %vm502_vm1, %v730_v0 }
 0x172   : > { %v815_v1 = vpop.f32.mrf.mxu2 }
 0x173   : > { %v844_v2 = vpop.f32.mrf.mxu3 }
 0x174   : > { %v845_v58 = vadd.f32 %v844_v2, %v815_v1 }
 0x176   : > { %1020 = vst.msk [vmem:[%s1592_s30 + $0x38] sm:$0xff] %vm502_vm1, %v845_v58 }
 0x177   : > { %s1022_s6 = sshll.u32 %s1234_s21, 1  ;;  %s1027_s0 = smul.u32 24, %s1238_s22 }
 0x178   : > { %s875_s10 = sshll.u32 %s1592_s30, 4  ;;  %s1252_s15 = smov 256   ;;  %s876_s10 = int_to_ptr.vmem [resolvable:$true] %s875_s10 }
 0x179   : > { %s862_s13 = sadd.s32 %s1027_s0, %s1022_s6  ;;  %1028 = sst [smem:[#allocation6]] (%p1349_p8), %s1252_s15 }
 0x17a   : > { %s1023_s14 = sshll.u32 %s862_s13, 3  ;;  %s1253_s27 = smov 768  }
 0x17b   : > { %s864_s17 = scalar_lea.hbm %s1664_s5, %s1023_s14  ;;  %1029 = sst [smem:[#allocation6 + $0x1]] (%p1349_p8), %s1253_s27 }
 0x17c   : > { %s877_s26 = sshll.u32 %s864_s17, 4  ;;  %s1254_s21 = smov 2   ;;  %s878_s26 = int_to_ptr.hbm [resolvable:$true] %s877_s26 }
 0x17d   : > { %1030 = sst [smem:[#allocation6 + $0x2]] (%p1349_p8), %s1254_s21  ;;  %s1255_s22 = smov 128  }
 0x17e   : > { %1031 = sst [smem:[#allocation6 + $0x3]] (%p1349_p8), %s1255_s22  ;;  %s1256_s30 = smov 8  }
 0x17f   : > { %1032 = sst [smem:[#allocation6 + $0x4]] (%p1349_p8), %s1255_s22  ;;  %s1257_s6 = smov [#allocation5]  }
 0x180   : > { %1033 = sst [smem:[#allocation6 + $0x5]] (%p1349_p8), %s1256_s30  ;;  %s1258_s0 = smov 0  }
 0x181   : > { %1034 = dma.general (%p1349_p8), %s876_s10, 1024, %s878_s26, %s851_s9, %s1257_s6, [#allocation6], %s1258_s0, 0  }
 0x182 PF: > { %p1040_p1 = scmp.ge.s32.totalorder %s1250_s25, 2  ;;  %s905_s13 = sand.u32 1, %s1222_s18  }
 0x183   : > { %s906_s14 = scalar_lea.sflag [#allocation4], %s905_s13 }
 0x184   : > { %p1037_p2 = pnand %p1040_p1, %p1353_p9 }
 0x186   : > { %p1038_p3 = pneg %p1037_p2 }
 0x188   : > { %1217 = dma.done.wait (%p1038_p3), %s906_s14, 1024  }
 0x189   : > { %1219 = vsyncadd (%p1038_p3), %s906_s14, 4294966272  ;;  %s18_s25 = sadd.s32 1, %s1250_s25   ;;  %s1670_s18 = smov %s1226_s19 }
 0x18a   : > { %p15_p4 = scmp.ge.s32.totalorder %s18_s25, 8   ;;  %s1671_s19 = smov %s1230_s20 }
 0x18b   : > { %s1672_s20 = smov %s1361_s12  ;;  %s1673_s21 = smov %s1242_s23 }
 0x18c   : > { %s1674_s22 = smov %s1246_s24  ;;  %s1675_s23 = smov %s1678_s28 }
 0x18d   : > { %s1676_s24 = smov %s1682_s29  ;;  %17 = sbr.rel (!%p15_p4) target bundleno = 7 (0x7), region = 130 }
 0x192   :  { %912 = vsyncpa [#allocation4], 1 }
 0x193   :  { %914 = vsyncpa [#allocation4 + $0x1], 1 }

</bundles_post_ra>
